<compile_context>
chip_gen: v7x
topology: tpu7x:2x2x1
jax: 0.10.0
libtpu: 0.0.40
codegen_flags: <defaults>
</compile_context>

<pallas_src>
import functools

import jax
import jax.numpy as jnp
from jax import lax
from jax.experimental import pallas as pl
from jax.experimental.pallas import tpu as pltpu


def _nt_xent_block_kernel(zi_ref, zj_ref, loss_part_ref, col_part_ref, row_acc,
                          *, inv_t, b_valid, tm, tn, needs_mask):
    """One (row-block i, col-block j) step over the B x B cross-view similarity block.

    zi_ref        : (tm, D) i-view rows, L2-normalized and pre-scaled by 1/T (bf16).
    zj_ref        : (tn, D) j-view rows, L2-normalized (bf16).
    loss_part_ref : (1, 1, 1)     per-row-block  sum_r log( sum_c exp(S[r,c]/T - 1/T) )
    col_part_ref  : (1, 1, 1, tn) per-(i,j)-block partial column sums of exp(S/T - 1/T)
    row_acc       : (tm, 1) VMEM scratch: row exp-sum accumulator across the j axis.
    """
    i = pl.program_id(0)
    j = pl.program_id(1)
    nj = pl.num_programs(1)

    @pl.when(j == 0)
    def _():
        row_acc[...] = jnp.zeros_like(row_acc)

    # MXU: low-precision operands, f32 accumulation, contraction on the last dim of both
    # operands (no transpose relayout).  1/T is already folded into zi.
    s_scaled = lax.dot_general(zi_ref[...], zj_ref[...],
                               dimension_numbers=(((1,), (1,)), ((), ())),
                               preferred_element_type=jnp.float32)      # (tm, tn)

    # cosine sim <= 1  =>  s_scaled <= 1/T ; constant shift keeps exp() <= 1 (no overflow).
    e = jnp.exp(s_scaled - inv_t)

    if needs_mask:  # static: only when B was zero-padded up to the tile size
        rows = lax.broadcasted_iota(jnp.int32, (tm, tn), 0) + i * tm
        cols = lax.broadcasted_iota(jnp.int32, (tm, tn), 1) + j * tn
        e = jnp.where(jnp.logical_and(rows < b_valid, cols < b_valid), e, 0.0)

    # Row / column exp-sum partials.
    # TODO(synk): if a profile shows the XLU reductions binding (small-D regime), move the
    # row-sum onto the idle MXU slot via dot(e, ones((tn, 1))).
    row_acc[...] += jnp.sum(e, axis=1, keepdims=True)                    # (tm, 1)
    col_part_ref[...] = jnp.sum(e, axis=0, keepdims=True).reshape(1, 1, 1, tn)

    # Per-row-block finalize: sum of log(row denominators) for this block's valid rows.
    @pl.when(j == nj - 1)
    def _():
        r = row_acc[...]
        if needs_mask:
            rid = lax.broadcasted_iota(jnp.int32, (tm, 1), 0) + i * tm
            r = jnp.where(rid < b_valid, r, 1.0)            # padded rows -> log(1) = 0
        loss_part_ref[...] = jnp.sum(jnp.log(r)).reshape(1, 1, 1)


def _round_up(x, m):
    return ((x + m - 1) // m) * m


def _vmem_capacity_bytes():
    try:
        return int(pltpu.get_tpu_info().vmem_capacity_bytes)
    except Exception:
        return 64 * 1024 * 1024          # conservative fallback: v7x per-TensorCore VMEM


def _pick_tiles(b, d, vmem_cap, in_bytes):
    """Pick (tm, tn, b_pad, est_vmem) from a ~40%-of-VMEM budget (D- and gen-aware)."""
    budget = int(0.40 * vmem_cap)

    def cost(tm, tn):
        return (2 * tm * d * in_bytes          # zi block, double-buffered
                + 2 * tn * d * in_bytes        # zj block, double-buffered
                + 4 * tm * tn * 4              # f32 sim/exp temporaries headroom
                + tm * 4 + 2 * tn * 4 + 4096)  # scratch + tiny partial outputs

    b8 = _round_up(b, 8)
    tm = None
    for c in (512, 256, 128, 64, 32, 16, 8):
        c = min(c, b8)
        if cost(c, c) <= budget:
            tm = c
            break
    if tm is None:
        tm = 8
        # TODO(synk): extreme-D case — a third (k) grid axis over D with an f32 sim
        # accumulator in scratch is needed; with tm=8 the inputs alone exceed the budget.
    b_pad = _round_up(b, tm)

    # Prefer >= 2 row blocks so the "parallel" axis can shard across v7x's 2 TensorCores.
    if b_pad // tm < 2 and tm >= 16 and b8 >= 128:
        tm = _round_up(tm // 2, 8)
        b_pad = _round_up(b, tm)

    # Keep the whole (padded) z_j view VMEM-resident (single column block) when it fits:
    # it is then DMA'd from HBM once instead of once per row block.
    tn = b_pad if cost(tm, b_pad) <= budget else tm
    return tm, tn, b_pad, cost(tm, tn)


def contrastive_loss3(emb_i, emb_j, temperature=0.25, compute_dtype=jnp.bfloat16):
    """JAX/Pallas equivalent of ContrastiveLoss3.forward(emb_i, emb_j)."""
    assert emb_i.shape == emb_j.shape and emb_i.ndim == 2
    b, d = emb_i.shape
    inv_t = 1.0 / float(temperature)
    eps2 = jnp.float32(1e-24)                 # (torch F.normalize eps = 1e-12) ** 2

    # ---- O(B*D) pre-pass in plain XLA (negligible next to the O(B^2*D) kernel) ---------
    # Normalize once (not per grid step), fold 1/T into the i-view, compute the positives
    # sum in f32, and cast the streamed operands to the MXU compute dtype.
    def _norm(x):
        xf = x.astype(jnp.float32)
        return xf * lax.rsqrt(jnp.maximum(jnp.sum(xf * xf, axis=1, keepdims=True), eps2))

    zi_f32 = _norm(emb_i)
    zj_f32 = _norm(emb_j)
    pos_sum_scaled = jnp.sum(zi_f32 * zj_f32) * jnp.float32(inv_t)   # sum_r S[r,r] / T

    zi = (zi_f32 * jnp.float32(inv_t)).astype(compute_dtype)         # = z_i / T
    zj = zj_f32.astype(compute_dtype)

    # ---- D- and generation-aware tiling; pad B to the row tile when needed -------------
    in_bytes = jnp.dtype(compute_dtype).itemsize
    vmem_cap = _vmem_capacity_bytes()
    tm, tn, b_pad, est_vmem = _pick_tiles(b, d, vmem_cap, in_bytes)
    needs_mask = b_pad != b
    if needs_mask:
        pad = ((0, b_pad - b), (0, 0))
        zi = jnp.pad(zi, pad)
        zj = jnp.pad(zj, pad)
    ni = b_pad // tm
    nj = b_pad // tn

    kernel = functools.partial(_nt_xent_block_kernel, inv_t=inv_t, b_valid=b,
                               tm=tm, tn=tn, needs_mask=needs_mask)

    cp_kwargs = dict(dimension_semantics=("parallel", "arbitrary"))
    if est_vmem > 12 * 1024 * 1024:
        # Leave the compiler headroom: never request more than ~75% of physical VMEM.
        cp_kwargs["vmem_limit_bytes"] = int(min(max(2 * est_vmem, 32 * 1024 * 1024),
                                                0.75 * vmem_cap))

    loss_part, col_part = pl.pallas_call(
        kernel,
        out_shape=(
            jax.ShapeDtypeStruct((ni, 1, 1), jnp.float32),       # per-row-block partial loss
            jax.ShapeDtypeStruct((ni, nj, 1, tn), jnp.float32),  # per-block partial col sums
        ),
        grid_spec=pltpu.PrefetchScalarGridSpec(
            num_scalar_prefetch=0,
            grid=(ni, nj),
            in_specs=[
                pl.BlockSpec((tm, d), lambda i, j: (i, 0)),      # z_i / T  row block
                pl.BlockSpec((tn, d), lambda i, j: (j, 0)),      # z_j      col block
                # TODO(synk): if a profile shows exposed DMA on the z_j stream, deepen it
                # with pipeline_mode=pl.Buffered(3) where the VMEM budget still allows.
            ],
            out_specs=(
                pl.BlockSpec((1, 1, 1), lambda i, j: (i, 0, 0)),
                pl.BlockSpec((1, 1, 1, tn), lambda i, j: (i, j, 0, 0)),
            ),
            scratch_shapes=[pltpu.VMEM((tm, 1), jnp.float32)],   # row exp-sum accumulator
        ),
        compiler_params=pltpu.CompilerParams(**cp_kwargs),
    )(zi, zj)

    # ---- tiny O(B) finalize in the wrapper ----------------------------------------------
    col_sums = jnp.sum(col_part[:, :, 0, :], axis=0).reshape(-1)[:b]    # (b,)
    n_rows = jnp.float32(2 * b)
    total = (jnp.sum(loss_part)                  # sum_rows log(row denominators) - shift
             + jnp.sum(jnp.log(col_sums))        # sum_cols log(col denominators) - shift
             + n_rows * jnp.float32(inv_t)       # add back the exp shift for all 2B rows
             - 2.0 * pos_sum_scaled)             # - sum positives / T (each pair twice)
    return total / n_rows


def _reference_loss(emb_i, emb_j, temperature=0.25):
    """Pure-JAX mirror of the PyTorch forward (full 2Bx2B path), for a sanity check."""
    def normalize(x):
        return x / jnp.maximum(jnp.linalg.norm(x, axis=1, keepdims=True), 1e-12)

    b = emb_i.shape[0]
    z = jnp.concatenate([normalize(emb_i), normalize(emb_j)], axis=0)
    sim = z @ z.T
    sim_ij = jnp.diagonal(sim, offset=b)
    sim_ji = jnp.diagonal(sim, offset=-b)
    positives = jnp.concatenate([sim_ij, sim_ji], axis=0)
    n = 2 * b
    mask = jnp.zeros((n, n), jnp.float32)
    mask = mask.at[0:b, b:n].set(1.0)
    mask = mask.at[b:n, 0:b].set(1.0)
    nominator = jnp.exp(positives / temperature)
    denominator = jnp.sum(mask * jnp.exp(sim / temperature), axis=1)
    return jnp.sum(-jnp.log(nominator / denominator)) / n


if __name__ == "__main__":
    temperature = 0.25  # deterministic "buffer" init, as in the module
    key = jax.random.PRNGKey(0)
    k1, k2, k3, k4 = jax.random.split(key, 4)

    # Case 1: batch not a multiple of the 8-row tile -> exercises zero-pad + mask path,
    # with the default bf16 MXU operands (loose tolerance per the review).
    emb_i = jax.random.normal(k1, (4, 32), dtype=jnp.float32)
    emb_j = jax.random.normal(k2, (4, 32), dtype=jnp.float32)
    loss = jax.block_until_ready(contrastive_loss3(emb_i, emb_j, temperature))
    ref = _reference_loss(emb_i, emb_j, temperature)
    assert jnp.allclose(loss, ref, rtol=3e-2, atol=3e-2), (loss, ref)

    # Case 2: exact-tile batch, f32 precision escape hatch -> tight tolerance.
    emb_i2 = jax.random.normal(k3, (8, 32), dtype=jnp.float32)
    emb_j2 = jax.random.normal(k4, (8, 32), dtype=jnp.float32)
    loss2 = jax.block_until_ready(
        contrastive_loss3(emb_i2, emb_j2, temperature, compute_dtype=jnp.float32))
    ref2 = _reference_loss(emb_i2, emb_j2, temperature)
    assert jnp.allclose(loss2, ref2, rtol=1e-5, atol=1e-5), (loss2, ref2)

    print("KERNEL_OK")
</pallas_src>

<mosaic_0001>
module attributes {stable_mosaic.version = 11 : i64} {
  func.func @_nt_xent_block_kernel(%arg0: i32, %arg1: i32, %arg2: memref<8x32xbf16, #tpu.memory_space<vmem>>, %arg3: memref<8x32xbf16, #tpu.memory_space<vmem>>, %arg4: memref<1x1x1xf32, #tpu.memory_space<vmem>>, %arg5: memref<1x1x1x8xf32, #tpu.memory_space<vmem>>, %arg6: memref<8x1xf32, #tpu.memory_space<vmem>>) attributes {dimension_semantics = [#tpu.dimension_semantics<parallel>, #tpu.dimension_semantics<arbitrary>], iteration_bounds = array<i64: 1, 1>, scalar_prefetch = 0 : i64, scratch_operands = 1 : i64, tpu.core_type = #tpu.core_type<tc>, window_params = [{transform_indices = @transform_0, window_bounds = array<i64: 8, 32>}, {transform_indices = @transform_1, window_bounds = array<i64: 8, 32>}, {transform_indices = @transform_2, window_bounds = array<i64: 1, 1, 1>}, {transform_indices = @transform_3, window_bounds = array<i64: 1, 1, 1, 8>}]} {
    %c0_i32 = arith.constant 0 : i32
    %0 = arith.cmpi eq, %arg1, %c0_i32 : i32
    %1 = arith.extui %0 : i1 to i32
    %c0_i32_0 = arith.constant 0 : i32
    %2 = arith.cmpi ne, %1, %c0_i32_0 : i32
    scf.if %2 {
      %cst_20 = arith.constant 0.000000e+00 : f32
      %36 = vector.broadcast %cst_20 : f32 to vector<8x1xf32>
      %c0_21 = arith.constant 0 : index
      %c0_22 = arith.constant 0 : index
      %37 = vector.load %arg6[%c0_21, %c0_22] : memref<8x1xf32, #tpu.memory_space<vmem>>, vector<8x1xf32>
      tpu.vector_store %arg6[%c0_21, %c0_22], %36 {strides = array<i32>} : memref<8x1xf32, #tpu.memory_space<vmem>>, vector<8x1xf32>,
    } else {
    }
    %c0 = arith.constant 0 : index
    %c0_1 = arith.constant 0 : index
    %3 = vector.load %arg2[%c0, %c0_1] : memref<8x32xbf16, #tpu.memory_space<vmem>>, vector<8x32xbf16>
    %c0_2 = arith.constant 0 : index
    %c0_3 = arith.constant 0 : index
    %4 = vector.load %arg3[%c0_2, %c0_3] : memref<8x32xbf16, #tpu.memory_space<vmem>>, vector<8x32xbf16>
    %cst = arith.constant dense<0.000000e+00> : vector<8x8xf32>
    %5 = tpu.matmul %3, %4, %cst {dimension_numbers = #tpu.dot_dimension_numbers<[1], [1], [0], [0], [0, 0, 1, 0], [], []>} : vector<8x32xbf16>, vector<8x32xbf16>, vector<8x8xf32> -> vector<8x8xf32>
    %cst_4 = arith.constant 4.000000e+00 : f32
    %6 = vector.broadcast %cst_4 : f32 to vector<8x8xf32>
    %7 = arith.subf %5, %6 : vector<8x8xf32>
    %8 = math.exp %7 : vector<8x8xf32>
    %9 = tpu.iota {dimensions = array<i32: 0>} : vector<8x8xi32>
    %c8_i32 = arith.constant 8 : i32
    %10 = arith.muli %arg0, %c8_i32 : i32
    %11 = vector.broadcast %10 : i32 to vector<8x8xi32>
    %12 = arith.addi %9, %11 : vector<8x8xi32>
    %13 = tpu.iota {dimensions = array<i32: 1>} : vector<8x8xi32>
    %c8_i32_5 = arith.constant 8 : i32
    %14 = arith.muli %arg1, %c8_i32_5 : i32
    %15 = vector.broadcast %14 : i32 to vector<8x8xi32>
    %16 = arith.addi %13, %15 : vector<8x8xi32>
    %c4_i32 = arith.constant 4 : i32
    %17 = vector.broadcast %c4_i32 : i32 to vector<8x8xi32>
    %18 = arith.cmpi slt, %12, %17 : vector<8x8xi32>
    %c4_i32_6 = arith.constant 4 : i32
    %19 = vector.broadcast %c4_i32_6 : i32 to vector<8x8xi32>
    %20 = arith.cmpi slt, %16, %19 : vector<8x8xi32>
    %21 = arith.andi %18, %20 : vector<8x8xi1>
    %cst_7 = arith.constant 0.000000e+00 : f32
    %22 = vector.broadcast %cst_7 : f32 to vector<8x8xf32>
    %23 = arith.select %21, %8, %22 : vector<8x8xi1>, vector<8x8xf32>
    %c0_8 = arith.constant 0 : index
    %c0_9 = arith.constant 0 : index
    %24 = vector.load %arg6[%c0_8, %c0_9] : memref<8x1xf32, #tpu.memory_space<vmem>>, vector<8x1xf32>
    %cst_10 = arith.constant dense<0.000000e+00> : vector<8xf32>
    %25 = vector.multi_reduction <add>, %23, %cst_10 [1] : vector<8x8xf32> to vector<8xf32>
    %26 = vector.shape_cast %25 : vector<8xf32> to vector<8x1xf32>
    %27 = arith.addf %24, %26 : vector<8x1xf32>
    %c0_11 = arith.constant 0 : index
    %c0_12 = arith.constant 0 : index
    %28 = vector.load %arg6[%c0_11, %c0_12] : memref<8x1xf32, #tpu.memory_space<vmem>>, vector<8x1xf32>
    tpu.vector_store %arg6[%c0_11, %c0_12], %27 {strides = array<i32>} : memref<8x1xf32, #tpu.memory_space<vmem>>, vector<8x1xf32>,
    %cst_13 = arith.constant dense<0.000000e+00> : vector<8xf32>
    %29 = vector.multi_reduction <add>, %23, %cst_13 [0] : vector<8x8xf32> to vector<8xf32>
    %30 = vector.shape_cast %29 : vector<8xf32> to vector<1x8xf32>
    %31 = vector.shape_cast %30 : vector<1x8xf32> to vector<1x1x1x8xf32>
    %c0_14 = arith.constant 0 : index
    %c0_15 = arith.constant 0 : index
    %c0_16 = arith.constant 0 : index
    %c0_17 = arith.constant 0 : index
    %32 = vector.load %arg5[%c0_14, %c0_15, %c0_16, %c0_17] : memref<1x1x1x8xf32, #tpu.memory_space<vmem>>, vector<1x1x1x8xf32>
    tpu.vector_store %arg5[%c0_14, %c0_15, %c0_16, %c0_17], %31 {strides = array<i32>} : memref<1x1x1x8xf32, #tpu.memory_space<vmem>>, vector<1x1x1x8xf32>,
    %c0_i32_18 = arith.constant 0 : i32
    %33 = arith.cmpi eq, %arg1, %c0_i32_18 : i32
    %34 = arith.extui %33 : i1 to i32
    %c0_i32_19 = arith.constant 0 : i32
    %35 = arith.cmpi ne, %34, %c0_i32_19 : i32
    scf.if %35 {
      %c0_20 = arith.constant 0 : index
      %c0_21 = arith.constant 0 : index
      %36 = vector.load %arg6[%c0_20, %c0_21] : memref<8x1xf32, #tpu.memory_space<vmem>>, vector<8x1xf32>
      %37 = tpu.iota {dimensions = array<i32: 0>} : vector<8x1xi32>
      %c8_i32_22 = arith.constant 8 : i32
      %38 = arith.muli %arg0, %c8_i32_22 : i32
      %39 = vector.broadcast %38 : i32 to vector<8x1xi32>
      %40 = arith.addi %37, %39 : vector<8x1xi32>
      %c4_i32_23 = arith.constant 4 : i32
      %41 = vector.broadcast %c4_i32_23 : i32 to vector<8x1xi32>
      %42 = arith.cmpi slt, %40, %41 : vector<8x1xi32>
      %cst_24 = arith.constant 1.000000e+00 : f32
      %43 = vector.broadcast %cst_24 : f32 to vector<8x1xf32>
      %44 = arith.select %42, %36, %43 : vector<8x1xi1>, vector<8x1xf32>
      %45 = math.log %44 : vector<8x1xf32>
      %46 = vector.shape_cast %45 : vector<8x1xf32> to vector<1x8x1xf32>
      %cst_25 = arith.constant dense<0.000000e+00> : vector<1xf32>
      %47 = vector.multi_reduction <add>, %46, %cst_25 [1, 2] : vector<1x8x1xf32> to vector<1xf32>
      %48 = vector.shape_cast %47 : vector<1xf32> to vector<1x1x1xf32>
      %49 = vector.extract %48[0, 0, 0] : f32 from vector<1x1x1xf32>
      %50 = vector.broadcast %49 : f32 to vector<1x1x1xf32>
      %c0_26 = arith.constant 0 : index
      %c0_27 = arith.constant 0 : index
      %c0_28 = arith.constant 0 : index
      %51 = vector.load %arg4[%c0_26, %c0_27, %c0_28] : memref<1x1x1xf32, #tpu.memory_space<vmem>>, vector<1x1x1xf32>
      tpu.vector_store %arg4[%c0_26, %c0_27, %c0_28], %50 {strides = array<i32>} : memref<1x1x1xf32, #tpu.memory_space<vmem>>, vector<1x1x1xf32>,
    } else {
    }
    return
  }
  func.func @transform_0(%arg0: i32, %arg1: i32) -> (i32, i32) {
    %c0_i32 = arith.constant 0 : i32
    %c0_i32_0 = arith.constant 0 : i32
    return %arg0, %c0_i32 : i32, i32
  }
  func.func @transform_1(%arg0: i32, %arg1: i32) -> (i32, i32) {
    %c0_i32 = arith.constant 0 : i32
    %c0_i32_0 = arith.constant 0 : i32
    return %arg1, %c0_i32 : i32, i32
  }
  func.func @transform_2(%arg0: i32, %arg1: i32) -> (i32, i32, i32) {
    %c0_i32 = arith.constant 0 : i32
    %c0_i32_0 = arith.constant 0 : i32
    %c0_i32_1 = arith.constant 0 : i32
    return %arg0, %c0_i32, %c0_i32_0 : i32, i32, i32
  }
  func.func @transform_3(%arg0: i32, %arg1: i32) -> (i32, i32, i32, i32) {
    %c0_i32 = arith.constant 0 : i32
    %c0_i32_0 = arith.constant 0 : i32
    %c0_i32_1 = arith.constant 0 : i32
    return %arg0, %arg1, %c0_i32, %c0_i32_0 : i32, i32, i32, i32
  }
}

</mosaic_0001>

<bundles_post_ra>
// kernel: tpu_custom_call.1
= control target key start
LH: loop header
LB: loop body
LE: loop exit
PB: predicated region body
PF: predicated region fallthrough
CT: control target
= control target key end

     0   :  { %9 = vsyncpa [#allocation4], 0  ;;  %s375_s0 = inlined_call_operand.hbm [shape: bf16[8,32], index: 0, kind: input, shape index: {}]   ;;  %s376_s1 = inlined_call_operand.hbm [shape: bf16[8,32], index: 1, kind: input, shape index: {}]   ;;  %s377_s2 = inlined_call_operand.hbm [shape: f32[1,1,1], index: 2, kind: output, shape index: {0}]   ;;  %s378_s3 = inlined_call_operand.hbm [shape: f32[1,1,1,8], index: 3, kind: output, shape index: {1}]  }
   0x1   :  { %10 = vsyncpa [#allocation7], 0 }
   0x2   :  { %11 = vsyncpa [#allocation5], 0 }
   0x3   :  { %12 = vsyncpa [#allocation10], 0  ;;  %s296_s12 = smov [#allocation3]   ;;  %s297_s14 = smov [#allocation6]  }
   0x4   :  { %s19_s13 = sshll.u32 %s296_s12, 4  ;;  %s29_s15 = sshll.u32 %s297_s14, 4  ;;  %s20_s13 = int_to_ptr.vmem [resolvable:$true] %s19_s13  ;;  %s30_s15 = int_to_ptr.vmem [resolvable:$true] %s29_s15 }
   0x5   :  { %s200_s18 = scalar_lea.hbm %s375_s0, 64 }
   0x6   :  { %p201_p0 = scmp.ne.s32.totalorder %s375_s0, %s200_s18  ;;  %p204_p1 = scmp.lt.u32.totalorder %s200_s18, %s375_s0 }
   0x8   :  { %p206_p2 = pnand %p204_p1, %p201_p0 }
   0xa   :  { %209 = shalt.err (!%p206_p2)
}
   0xb   :  { %s210_s23 = scalar_lea.vmem %s20_s13, 64  ;;  %p215_p4 = scmp.lt.s32.totalorder %s20_s13, %s20_s13 }
   0xc   :  { %p211_p3 = scmp.ne.s32.totalorder %s20_s13, %s210_s23  ;;  %p216_p5 = scmp.lt.s32.totalorder %s210_s23, %s210_s23 }
   0xe   :  { %p217_p6 = por %p216_p5, %p215_p4 }
  0x10   :  { %p218_p7 = pnand %p217_p6, %p211_p3 }
  0x12   :  { %221 = shalt.err (!%p218_p7)
}
  0x13   :  { %22 = dma.hbm_to_vmem [thread:$0]  %s375_s0, 64, %s20_s13, [#allocation4]  }
  0x14   :  { %s222_s28 = scalar_lea.hbm %s376_s1, 64 }
  0x15   :  { %p223_p8 = scmp.ne.s32.totalorder %s376_s1, %s222_s28  ;;  %p226_p9 = scmp.lt.u32.totalorder %s222_s28, %s376_s1 }
  0x17   :  { %p228_p10 = pnand %p226_p9, %p223_p8 }
  0x19   :  { %231 = shalt.err (!%p228_p10)
}
  0x1a   :  { %s232_s6 = scalar_lea.vmem %s30_s15, 64  ;;  %p237_p12 = scmp.lt.s32.totalorder %s30_s15, %s30_s15 }
  0x1b   :  { %p233_p11 = scmp.ne.s32.totalorder %s30_s15, %s232_s6  ;;  %p238_p13 = scmp.lt.s32.totalorder %s232_s6, %s232_s6 }
  0x1d   :  { %p239_p0 = por %p238_p13, %p237_p12 }
  0x1f   :  { %p240_p1 = pnand %p239_p0, %p233_p11 }
  0x21   :  { %243 = shalt.err (!%p240_p1)
}
  0x22   :  { %32 = dma.hbm_to_vmem [thread:$0]  %s376_s1, 64, %s30_s15, [#allocation7]  }
  0x23   :  { %288 = dma.done.wait [#allocation4], 64  }
  0x24   :  { %289 = vsyncadd [#allocation4], 4294967232 }
  0x25   :  { %290 = dma.done.wait [#allocation7], 64  }
  0x26   :  { %291 = vsyncadd [#allocation7], 4294967232  ;;  %v298_v0 = vmov 0.0   ;;  %vm299_vm0 = vmmov 0   ;;  %vm48_vm1 = vcmask 261120   ;;  %vm44_vm2 = vcmask 7168  }
  0x27   :  { %182 = vmatprep.subr.bf16.mxu0 %v298_v0  ;;  %184 = vmatprep.mubr.msk.bf16.mxu0 %vm299_vm0, %v298_v0  ;;  %v47_v1 = vld [vmem:[#allocation6] sm:$0xf]  ;;  %v46_v3 = vld [vmem:[#allocation3] sm:$0xf]  ;;  %45 = vst.msk [vmem:[#allocation2] sm:$0xff] %vm44_vm2, %v298_v0  ;;  %v98_v8 = vlaneseq  ;;  %vm113_vm6 = vcmask 64512  }
  0x28   :  { %v53_v2 = vsel %vm48_vm1, %v47_v1, 0  ;;  %vm126_vm7 = vcmask 57344   ;;  %s300_s1 = smov [#allocation9]  }
  0x29   :  { %183 = vmatpush3.bf16.xpose.msra.mxu0 %v53_v2  ;;  %v99_v11 = vshrl.u32 %v98_v8, 7  ;;  %v104_v12 = vand.u32 127, %v98_v8  ;;  %s164_s8 = sshll.u32 %s300_s1, 4  ;;  %s165_s8 = int_to_ptr.vmem [resolvable:$true] %s164_s8 }
  0x2a   :  { %s244_s9 = scalar_lea.vmem %s165_s8, 16  ;;  %s248_s10 = scalar_lea.vmem %s165_s8, 32 }
  0x2b   :  { %vm108_vm3 = vcmp.lt.s32.totalorder %v99_v11, 4  ;;  %vm109_vm4 = vcmp.lt.s32.totalorder %v104_v12, 4  ;;  %p245_p2 = scmp.ne.s32.totalorder %s165_s8, %s244_s9  ;;  %p249_p3 = scmp.lt.s32.totalorder %s165_s8, %s165_s8 }
  0x2c   :  { %vm110_vm5 = vmand %vm108_vm3, %vm109_vm4  ;;  %p250_p4 = scmp.lt.s32.totalorder %s248_s10, %s244_s9 }
  0x2e   :  { %v112_v22 = vld [vmem:[#allocation2] sm:$0xff]  ;;  %p251_p5 = por %p250_p4, %p249_p3 }
  0x30   :  { %185 = vmatmul.mubr.msk.bf16.vlgmr.msra.gmra.mrb[0].mxu0 %vm48_vm1, %v46_v3  ;;  %p252_p6 = pnand %p251_p5, %p245_p2 }
 0x103   :  { %v89_v4 = vpop.f32.mrb[0].mxu0 }
 0x104   :  { %v179_v5 = vadd.f32 -4.0, %v89_v4  ;;  %v186_v6 = vpop.f32.mrb[1].mxu0 }
 0x105   :  { %v92_v7 = vpop.f32.mrb[2].mxu0 }
 0x106   :  { %v96_v9 = vmul.f32 1.442695, %v179_v5  ;;  %v187_v10 = vpop.f32.mrb[3].mxu0 }
 0x108   :  { %196 = vpow2.f32 %v96_v9 }
 0x112   :  { %v197_v13 = vpop.eup %196 }
 0x113   :  { %v111_v14 = vsel %vm110_vm5, %v197_v13, 0.0 }
 0x114   :  { %v114_v15 = vsel %vm113_vm6, %v111_v14, 0.0 }
 0x115   :  { %115 = vadd.xlane.f32.xlu0 %v114_v15  ;;  %v120_v16 = vrot.slane %v114_v15, 4 }
 0x117   :  { %v121_v17 = vadd.f32 %v120_v16, %v114_v15 }
 0x119   :  { %v122_v18 = vrot.slane %v121_v17, 2 }
 0x11b   :  { %v123_v19 = vadd.f32 %v122_v18, %v121_v17 }
 0x11d   :  { %v124_v20 = vrot.slane %v123_v19, 1 }
 0x11f   :  { %v125_v21 = vadd.f32 %v124_v20, %v123_v19 }
 0x121   :  { %127 = vst.msk [vmem:[#allocation9] sm:$0x1] %vm126_vm7, %v125_v21 }
 0x1a2   :  { %v116_v23 = vpop.xlane.xlu0 %115 }
 0x1a3   :  { %v117_v24 = vadd.f32 %v116_v23, %v112_v22 }
 0x1a5   :  { %119 = vst.msk [vmem:[#allocation2] sm:$0xff] %vm44_vm2, %v117_v24 }
 0x1ac   :  { %v131_v25 = vld [vmem:[#allocation2] sm:$0xff] }
 0x1ad   :  { %v132_v26 = vsel %vm108_vm3, %v131_v25, 1.0 }
 0x1ae   :  { %198 = vlog2.f32 %v132_v26 }
 0x1b8   :  { %v199_v27 = vpop.eup %198 }
 0x1b9   :  { %v134_v28 = vmul.f32 0.6931472, %v199_v27 }
 0x1bb   :  { %v135_v29 = vsel %vm44_vm2, %v134_v28, 0.0 }
 0x1bc   :  { %136 = vadd.xlane.f32.xlu0 %v135_v29 }
 0x1bd   :  { %255 = shalt.err (!%p252_p6)
}
 0x1be   :  { %s256_s13 = scalar_lea.hbm %s378_s3, 16 }
 0x1bf   :  { %p257_p7 = scmp.ne.s32.totalorder %s378_s3, %s256_s13  ;;  %p260_p8 = scmp.lt.u32.totalorder %s256_s13, %s378_s3 }
 0x1c1   :  { %p262_p9 = pnand %p260_p8, %p257_p7 }
 0x1c3   :  { %265 = shalt.err (!%p262_p9)
}
 0x1c4   :  { %167 = dma.vmem_to_hbm [thread:$0]  %s165_s8, 16, %s378_s3, [#allocation10]   ;;  %vm146_vm8 = vcmask 0  }
 0x1c5   :  { %s301_s20 = smov [#allocation8]  }
 0x1c6   :  { %s154_s21 = sshll.u32 %s301_s20, 4  ;;  %s155_s21 = int_to_ptr.vmem [resolvable:$true] %s154_s21 }
 0x1c7   :  { %s266_s23 = scalar_lea.vmem %s155_s21, 16  ;;  %s270_s24 = scalar_lea.vmem %s155_s21, 32 }
 0x1c8   :  { %p267_p10 = scmp.ne.s32.totalorder %s155_s21, %s266_s23  ;;  %p271_p11 = scmp.lt.s32.totalorder %s155_s21, %s155_s21 }
 0x1c9   :  { %p272_p12 = scmp.lt.s32.totalorder %s270_s24, %s266_s23 }
 0x1cb   :  { %p273_p13 = por %p272_p12, %p271_p11 }
 0x1cd   :  { %p274_p0 = pnand %p273_p13, %p267_p10 }
 0x249   :  { %v137_v30 = vpop.xlane.xlu0 %136 }
 0x24a   :  { %v138_v31 = vrot.slane %v137_v30, 4 }
 0x24c   :  { %v139_v32 = vadd.f32 %v138_v31, %v137_v30 }
 0x24e   :  { %v140_v33 = vrot.slane %v139_v32, 2 }
 0x250   :  { %v141_v34 = vadd.f32 %v140_v33, %v139_v32 }
 0x252   :  { %v142_v35 = vrot.slane %v141_v34, 1 }
 0x254   :  { %v143_v36 = vadd.f32 %v142_v35, %v141_v34 }
 0x256   :  { %188 = vpush %v143_v36 }
 0x287   :  { %s189_s22 = spop %188 }
 0x288   :  { %v145_v37 = vstv %s189_s22 }
 0x289   :  { %147 = vst.msk [vmem:[#allocation8] sm:$0x1] %vm146_vm8, %v145_v37 }
 0x28a   :  { %277 = shalt.err (!%p274_p0)
}
 0x28b   :  { %s278_s26 = scalar_lea.hbm %s377_s2, 16 }
 0x28c   :  { %p279_p1 = scmp.ne.s32.totalorder %s377_s2, %s278_s26  ;;  %p282_p2 = scmp.lt.u32.totalorder %s278_s26, %s377_s2 }
 0x28e   :  { %p284_p3 = pnand %p282_p2, %p279_p1 }
 0x290   :  { %287 = shalt.err (!%p284_p3)
}
 0x291   :  { %157 = dma.vmem_to_hbm [thread:$0]  %s155_s21, 16, %s377_s2, [#allocation5]  }
 0x292   :  { %292 = dma.done.wait [#allocation5], 16  }
 0x293   :  { %293 = vsyncadd [#allocation5], 4294967280 }
 0x294   :  { %294 = dma.done.wait [#allocation10], 16  }
 0x295   :  { %295 = vsyncadd [#allocation10], 4294967280 }
 0x296   :  { %174 = vsyncpa [#allocation4], 1 }
 0x297   :  { %175 = vsyncpa [#allocation7], 1 }
 0x298   :  { %176 = vsyncpa [#allocation5], 1 }
 0x299   :  { %177 = vsyncpa [#allocation10], 1 }

</bundles_post_ra>
